<compile_context>
chip_gen: v7x
topology: tpu7x:2x2x1
jax: 0.10.0
libtpu: 0.0.40
codegen_flags: <defaults>
</compile_context>

<pallas_src>
import functools

import jax
import jax.numpy as jnp
from jax.experimental import pallas as pl
from jax.experimental.pallas import tpu as pltpu

_LANE = 128


def _round_up(x, m):
    return (x + m - 1) // m * m


def _spatial_proj_kernel(x_ref, w1_ref, w2_ref, wp_ref, bias_ref,
                         pred_ref, proj_ref, *, Hp, Fp, Op):
    # x tile: (TB, F) bf16 ; weights: bf16, resident ; bias slab: (3, P) f32.
    x = x_ref[...]

    b1 = bias_ref[0:1, :Hp]          # (1, Hp) f32
    b2 = bias_ref[1:2, :Fp]          # (1, Fp) f32
    bp = bias_ref[2:3, :Op]          # (1, Op) f32

    # layer 1: MXU bf16 matmul, f32 accumulate; f32 bias+ReLU epilogue (VPU).
    h = jnp.dot(x, w1_ref[...], preferred_element_type=jnp.float32)
    h = jnp.maximum(h + b1, 0.0)

    # layer 2 -> proj (lane-dense padded width Fp).
    proj = jnp.dot(h.astype(w2_ref.dtype), w2_ref[...],
                   preferred_element_type=jnp.float32)
    proj = jnp.maximum(proj + b2, 0.0)

    # fc_pred -> pred (lane-dense padded width Op).
    pred = jnp.dot(proj.astype(wp_ref.dtype), wp_ref[...],
                   preferred_element_type=jnp.float32)
    pred = pred + bp

    proj_ref[...] = proj.astype(proj_ref.dtype)
    pred_ref[...] = pred.astype(pred_ref.dtype)


def spatial_proj(x, params, *, tb=1024):
    """x: (B, num_feat) float32. params = (w1,b1,w2,b2,wp,bp) with weights
    stored (in_features, out_features). Returns (pred, proj) in float32."""
    w1, b1, w2, b2, wp, bp = params
    B, F = x.shape
    H = w1.shape[1]
    O = wp.shape[1]

    # ---- lane-dense padding of the *output* dims (exact: zero pad + ReLU(0)=0)
    Hp = _round_up(H, _LANE)
    Fp = _round_up(F, _LANE)
    Op = _round_up(O, _LANE)
    P = max(Hp, Fp, Op)

    bf16 = jnp.bfloat16
    w1p = jnp.zeros((F, Hp), bf16).at[:, :H].set(w1.astype(bf16))
    w2p = jnp.zeros((Hp, Fp), bf16).at[:H, :F].set(w2.astype(bf16))
    wpp = jnp.zeros((Fp, Op), bf16).at[:F, :O].set(wp.astype(bf16))

    bias = jnp.zeros((3, P), jnp.float32)
    bias = bias.at[0, :H].set(b1.reshape(-1).astype(jnp.float32))
    bias = bias.at[1, :F].set(b2.reshape(-1).astype(jnp.float32))
    bias = bias.at[2, :O].set(bp.reshape(-1).astype(jnp.float32))

    # ---- batch tiling (512-1024 row tiles; sized well under v7x's 32 MiB
    #      default scoped VMEM even with 2x buffering of the f32 output tiles).
    TB = min(tb, _round_up(B, 8))
    Bp = _round_up(B, TB)
    xb = x.astype(bf16)
    if Bp != B:
        xb = jnp.pad(xb, ((0, Bp - B), (0, 0)))

    grid = (Bp // TB,)

    flops = 2 * B * (F * H + H * F + F * O)
    bytes_accessed = (xb.size * 2 + w1p.size * 2 + w2p.size * 2 + wpp.size * 2
                      + bias.size * 4 + Bp * Op * 4 + Bp * Fp * 4)
    cost = pl.CostEstimate(flops=flops, transcendentals=0,
                           bytes_accessed=bytes_accessed)

    kernel = functools.partial(_spatial_proj_kernel, Hp=Hp, Fp=Fp, Op=Op)

    pred_p, proj_p = pl.pallas_call(
        kernel,
        out_shape=(
            jax.ShapeDtypeStruct((Bp, Op), jnp.float32),   # pred (padded)
            jax.ShapeDtypeStruct((Bp, Fp), jnp.float32),   # proj (padded)
        ),
        grid=grid,
        in_specs=[
            pl.BlockSpec((TB, F), lambda i: (i, 0)),    # x: streamed over batch
            pl.BlockSpec((F, Hp), lambda i: (0, 0)),    # W1: resident
            pl.BlockSpec((Hp, Fp), lambda i: (0, 0)),   # W2: resident
            pl.BlockSpec((Fp, Op), lambda i: (0, 0)),   # Wp: resident
            pl.BlockSpec((3, P), lambda i: (0, 0)),     # packed biases: resident
        ],
        out_specs=(
            pl.BlockSpec((TB, Op), lambda i: (i, 0)),
            pl.BlockSpec((TB, Fp), lambda i: (i, 0)),
        ),
        compiler_params=pltpu.CompilerParams(
            dimension_semantics=("parallel",)),
        cost_estimate=cost,
    )(xb, w1p, w2p, wpp, bias)

    pred = pred_p[:B, :O]
    proj = proj_p[:B, :F]
    return pred, proj


def init_params(key, num_outputs, num_feat, expand=1.5):
    """Deterministic synthetic init (shapes match the PyTorch module)."""
    hidden = int(num_feat * expand)
    ks = jax.random.split(key, 6)
    scale = 0.1
    w1 = scale * jax.random.normal(ks[0], (num_feat, hidden), jnp.float32)
    b1 = scale * jax.random.normal(ks[1], (hidden,), jnp.float32)
    w2 = scale * jax.random.normal(ks[2], (hidden, num_feat), jnp.float32)
    b2 = scale * jax.random.normal(ks[3], (num_feat,), jnp.float32)
    wp = scale * jax.random.normal(ks[4], (num_feat, num_outputs), jnp.float32)
    bp = scale * jax.random.normal(ks[5], (num_outputs,), jnp.float32)
    return (w1, b1, w2, b2, wp, bp)


def _reference(x, params):
    """Pure-JAX reference mirroring the kernel's dtype policy
    (bf16 MXU operands, f32 accumulate, f32 epilogue)."""
    w1, b1, w2, b2, wp, bp = params
    bf16, f32 = jnp.bfloat16, jnp.float32
    h = jnp.dot(x.astype(bf16), w1.astype(bf16), preferred_element_type=f32)
    h = jnp.maximum(h + b1, 0.0)
    proj = jnp.dot(h.astype(bf16), w2.astype(bf16), preferred_element_type=f32)
    proj = jnp.maximum(proj + b2, 0.0)
    pred = jnp.dot(proj.astype(bf16), wp.astype(bf16), preferred_element_type=f32)
    pred = pred + bp
    return pred, proj


if __name__ == "__main__":
    key = jax.random.PRNGKey(0)
    kx, kp = jax.random.split(key)

    batch, num_feat, num_outputs = 8, 32, 4   # hidden = int(32 * 1.5) = 48
    x = jax.random.normal(kx, (batch, num_feat), jnp.float32)
    params = init_params(kp, num_outputs, num_feat, expand=1.5)

    pred, proj = spatial_proj(x, params)
    jax.block_until_ready((pred, proj))

    ref_pred, ref_proj = _reference(x, params)
    assert pred.shape == (batch, num_outputs) and proj.shape == (batch, num_feat)
    assert jnp.allclose(pred, ref_pred, atol=1e-2, rtol=1e-2)
    assert jnp.allclose(proj, ref_proj, atol=1e-2, rtol=1e-2)

    print("KERNEL_OK")
</pallas_src>

<mosaic_0001>
module attributes {stable_mosaic.version = 11 : i64} {
  func.func @_spatial_proj_kernel(%arg0: i32, %arg1: memref<8x32xbf16, #tpu.memory_space<vmem>>, %arg2: memref<32x128xbf16, #tpu.memory_space<vmem>>, %arg3: memref<128x128xbf16, #tpu.memory_space<vmem>>, %arg4: memref<128x128xbf16, #tpu.memory_space<vmem>>, %arg5: memref<3x128xf32, #tpu.memory_space<vmem>>, %arg6: memref<8x128xf32, #tpu.memory_space<vmem>>, %arg7: memref<8x128xf32, #tpu.memory_space<vmem>>) attributes {dimension_semantics = [#tpu.dimension_semantics<parallel>], iteration_bounds = array<i64: 1>, scalar_prefetch = 0 : i64, scratch_operands = 0 : i64, tpu.core_type = #tpu.core_type<tc>, window_params = [{transform_indices = @transform_0, window_bounds = array<i64: 8, 32>}, {pipeline_mode = #tpu.pipeline_mode<synchronous>, transform_indices = @transform_1, window_bounds = array<i64: 32, 128>}, {pipeline_mode = #tpu.pipeline_mode<synchronous>, transform_indices = @transform_2, window_bounds = array<i64: 128, 128>}, {pipeline_mode = #tpu.pipeline_mode<synchronous>, transform_indices = @transform_3, window_bounds = array<i64: 128, 128>}, {pipeline_mode = #tpu.pipeline_mode<synchronous>, transform_indices = @transform_4, window_bounds = array<i64: 3, 128>}, {transform_indices = @transform_5, window_bounds = array<i64: 8, 128>}, {transform_indices = @transform_6, window_bounds = array<i64: 8, 128>}]} {
    %c0 = arith.constant 0 : index
    %c0_0 = arith.constant 0 : index
    %0 = vector.load %arg1[%c0, %c0_0] : memref<8x32xbf16, #tpu.memory_space<vmem>>, vector<8x32xbf16>
    %c0_1 = arith.constant 0 : index
    %c0_2 = arith.constant 0 : index
    %1 = vector.load %arg5[%c0_1, %c0_2] : memref<3x128xf32, #tpu.memory_space<vmem>>, vector<1x128xf32>
    %c1 = arith.constant 1 : index
    %c0_3 = arith.constant 0 : index
    %2 = vector.load %arg5[%c1, %c0_3] : memref<3x128xf32, #tpu.memory_space<vmem>>, vector<1x128xf32>
    %c2 = arith.constant 2 : index
    %c0_4 = arith.constant 0 : index
    %3 = vector.load %arg5[%c2, %c0_4] : memref<3x128xf32, #tpu.memory_space<vmem>>, vector<1x128xf32>
    %c0_5 = arith.constant 0 : index
    %c0_6 = arith.constant 0 : index
    %4 = vector.load %arg2[%c0_5, %c0_6] : memref<32x128xbf16, #tpu.memory_space<vmem>>, vector<32x128xbf16>
    %cst = arith.constant dense<0.000000e+00> : vector<8x128xf32>
    %5 = tpu.matmul %0, %4, %cst {dimension_numbers = #tpu.dot_dimension_numbers<[1], [0], [0], [1], [0, 0, 1, 1], [], []>} : vector<8x32xbf16>, vector<32x128xbf16>, vector<8x128xf32> -> vector<8x128xf32>
    %6 = vector.broadcast %1 : vector<1x128xf32> to vector<8x128xf32>
    %7 = arith.addf %5, %6 : vector<8x128xf32>
    %cst_7 = arith.constant 0.000000e+00 : f32
    %8 = vector.broadcast %cst_7 : f32 to vector<8x128xf32>
    %9 = arith.maximumf %7, %8 : vector<8x128xf32>
    %10 = arith.truncf %9 : vector<8x128xf32> to vector<8x128xbf16>
    %c0_8 = arith.constant 0 : index
    %c0_9 = arith.constant 0 : index
    %11 = vector.load %arg3[%c0_8, %c0_9] : memref<128x128xbf16, #tpu.memory_space<vmem>>, vector<128x128xbf16>
    %cst_10 = arith.constant dense<0.000000e+00> : vector<8x128xf32>
    %12 = tpu.matmul %10, %11, %cst_10 {dimension_numbers = #tpu.dot_dimension_numbers<[1], [0], [0], [1], [0, 0, 1, 1], [], []>} : vector<8x128xbf16>, vector<128x128xbf16>, vector<8x128xf32> -> vector<8x128xf32>
    %13 = vector.broadcast %2 : vector<1x128xf32> to vector<8x128xf32>
    %14 = arith.addf %12, %13 : vector<8x128xf32>
    %cst_11 = arith.constant 0.000000e+00 : f32
    %15 = vector.broadcast %cst_11 : f32 to vector<8x128xf32>
    %16 = arith.maximumf %14, %15 : vector<8x128xf32>
    %17 = arith.truncf %16 : vector<8x128xf32> to vector<8x128xbf16>
    %c0_12 = arith.constant 0 : index
    %c0_13 = arith.constant 0 : index
    %18 = vector.load %arg4[%c0_12, %c0_13] : memref<128x128xbf16, #tpu.memory_space<vmem>>, vector<128x128xbf16>
    %cst_14 = arith.constant dense<0.000000e+00> : vector<8x128xf32>
    %19 = tpu.matmul %17, %18, %cst_14 {dimension_numbers = #tpu.dot_dimension_numbers<[1], [0], [0], [1], [0, 0, 1, 1], [], []>} : vector<8x128xbf16>, vector<128x128xbf16>, vector<8x128xf32> -> vector<8x128xf32>
    %20 = vector.broadcast %3 : vector<1x128xf32> to vector<8x128xf32>
    %21 = arith.addf %19, %20 : vector<8x128xf32>
    %c0_15 = arith.constant 0 : index
    %c0_16 = arith.constant 0 : index
    %22 = vector.load %arg7[%c0_15, %c0_16] : memref<8x128xf32, #tpu.memory_space<vmem>>, vector<8x128xf32>
    tpu.vector_store %arg7[%c0_15, %c0_16], %16 {strides = array<i32>} : memref<8x128xf32, #tpu.memory_space<vmem>>, vector<8x128xf32>,
    %c0_17 = arith.constant 0 : index
    %c0_18 = arith.constant 0 : index
    %23 = vector.load %arg6[%c0_17, %c0_18] : memref<8x128xf32, #tpu.memory_space<vmem>>, vector<8x128xf32>
    tpu.vector_store %arg6[%c0_17, %c0_18], %21 {strides = array<i32>} : memref<8x128xf32, #tpu.memory_space<vmem>>, vector<8x128xf32>,
    return
  }
  func.func @transform_0(%arg0: i32) -> (i32, i32) {
    %c0_i32 = arith.constant 0 : i32
    %c0_i32_0 = arith.constant 0 : i32
    return %arg0, %c0_i32 : i32, i32
  }
  func.func @transform_1(%arg0: i32) -> (i32, i32) {
    %c0_i32 = arith.constant 0 : i32
    %c0_i32_0 = arith.constant 0 : i32
    %c0_i32_1 = arith.constant 0 : i32
    return %c0_i32, %c0_i32_0 : i32, i32
  }
  func.func @transform_2(%arg0: i32) -> (i32, i32) {
    %c0_i32 = arith.constant 0 : i32
    %c0_i32_0 = arith.constant 0 : i32
    %c0_i32_1 = arith.constant 0 : i32
    return %c0_i32, %c0_i32_0 : i32, i32
  }
  func.func @transform_3(%arg0: i32) -> (i32, i32) {
    %c0_i32 = arith.constant 0 : i32
    %c0_i32_0 = arith.constant 0 : i32
    %c0_i32_1 = arith.constant 0 : i32
    return %c0_i32, %c0_i32_0 : i32, i32
  }
  func.func @transform_4(%arg0: i32) -> (i32, i32) {
    %c0_i32 = arith.constant 0 : i32
    %c0_i32_0 = arith.constant 0 : i32
    %c0_i32_1 = arith.constant 0 : i32
    return %c0_i32, %c0_i32_0 : i32, i32
  }
  func.func @transform_5(%arg0: i32) -> (i32, i32) {
    %c0_i32 = arith.constant 0 : i32
    %c0_i32_0 = arith.constant 0 : i32
    return %arg0, %c0_i32 : i32, i32
  }
  func.func @transform_6(%arg0: i32) -> (i32, i32) {
    %c0_i32 = arith.constant 0 : i32
    %c0_i32_0 = arith.constant 0 : i32
    return %arg0, %c0_i32 : i32, i32
  }
}

</mosaic_0001>

<bundles_post_ra>
// kernel: tpu_custom_call.1
= control target key start
LH: loop header
LB: loop body
LE: loop exit
PB: predicated region body
PF: predicated region fallthrough
CT: control target
= control target key end

     0   :  { %12 = vsyncpa [#allocation3], 0  ;;  %s819_s0 = inlined_call_operand.hbm [shape: bf16[8,32], index: 0, kind: input, shape index: {}]   ;;  %s820_s1 = inlined_call_operand.hbm [shape: bf16[32,128], index: 1, kind: input, shape index: {}]   ;;  %s821_s2 = inlined_call_operand.hbm [shape: bf16[128,128], index: 2, kind: input, shape index: {}]   ;;  %s822_s3 = inlined_call_operand.hbm [shape: bf16[128,128], index: 3, kind: input, shape index: {}]   ;;  %s823_s4 = inlined_call_operand.vmem [shape: f32[3,128], index: 4, kind: input, shape index: {}]   ;;  %s824_s5 = inlined_call_operand.hbm [shape: f32[8,128], index: 5, kind: output, shape index: {0}]   ;;  %s825_s6 = inlined_call_operand.hbm [shape: f32[8,128], index: 6, kind: output, shape index: {1}]  }
   0x1   :  { %13 = vsyncpa [#allocation6], 0 }
   0x2   :  { %14 = vsyncpa [#allocation9], 0 }
   0x3   :  { %15 = vsyncpa [#allocation4], 0 }
   0x4   :  { %16 = vsyncpa [#allocation12], 0  ;;  %s660_s21 = smov [#allocation5]   ;;  %s518_s25 = scalar_lea.hbm %s820_s1, 256 }
   0x5   :  { %s32_s22 = sshll.u32 %s660_s21, 4  ;;  %p519_p0 = scmp.ne.s32.totalorder %s820_s1, %s518_s25  ;;  %s33_s22 = int_to_ptr.vmem [resolvable:$true] %s32_s22 }
   0x6   :  { %p522_p1 = scmp.lt.u32.totalorder %s518_s25, %s820_s1 }
   0x8   :  { %p524_p2 = pnand %p522_p1, %p519_p0 }
   0xa   :  { %527 = shalt.err (!%p524_p2)
}
   0xb   :  { %s528_s30 = scalar_lea.vmem %s33_s22, 256  ;;  %p533_p4 = scmp.lt.s32.totalorder %s33_s22, %s33_s22 }
   0xc   :  { %p529_p3 = scmp.ne.s32.totalorder %s33_s22, %s528_s30  ;;  %p534_p5 = scmp.lt.s32.totalorder %s528_s30, %s528_s30 }
   0xe   :  { %p535_p6 = por %p534_p5, %p533_p4 }
  0x10   :  { %p536_p7 = pnand %p535_p6, %p529_p3 }
  0x12   :  { %539 = shalt.err (!%p536_p7)
}
  0x13   :  { %s661_s7 = smov 64   ;;  %s662_s8 = smov 4  }
  0x14   :  { %38 = dma.hbm_to_vmem [thread:$0]  %s820_s1, 256, %s33_s22, [#allocation6], %s661_s7, %s661_s7, %s662_s8  }
  0x15   :  { %s663_s11 = smov [#allocation2]   ;;  %s664_s13 = smov [#allocation7]  }
  0x16   :  { %s23_s12 = sshll.u32 %s663_s11, 4  ;;  %s44_s14 = sshll.u32 %s664_s13, 4  ;;  %s24_s12 = int_to_ptr.vmem [resolvable:$true] %s23_s12  ;;  %s45_s14 = int_to_ptr.vmem [resolvable:$true] %s44_s14 }
  0x17   :  { %s540_s17 = scalar_lea.hbm %s819_s0, 64 }
  0x18   :  { %p541_p8 = scmp.ne.s32.totalorder %s819_s0, %s540_s17  ;;  %p544_p9 = scmp.lt.u32.totalorder %s540_s17, %s819_s0 }
  0x1a   :  { %p546_p10 = pnand %p544_p9, %p541_p8 }
  0x1c   :  { %549 = shalt.err (!%p546_p10)
}
  0x1d   :  { %s550_s1 = scalar_lea.vmem %s24_s12, 64  ;;  %p555_p12 = scmp.lt.s32.totalorder %s24_s12, %s24_s12 }
  0x1e   :  { %p551_p11 = scmp.ne.s32.totalorder %s24_s12, %s550_s1  ;;  %p556_p13 = scmp.lt.s32.totalorder %s550_s1, %s550_s1 }
  0x20   :  { %p557_p0 = por %p556_p13, %p555_p12 }
  0x22   :  { %p558_p1 = pnand %p557_p0, %p551_p11 }
  0x24   :  { %561 = shalt.err (!%p558_p1)
}
  0x25   :  { %26 = dma.hbm_to_vmem [thread:$0]  %s819_s0, 64, %s24_s12, [#allocation3]  }
  0x26   :  { %s562_s26 = scalar_lea.hbm %s821_s2, 1024 }
  0x27   :  { %p563_p2 = scmp.ne.s32.totalorder %s821_s2, %s562_s26  ;;  %p566_p3 = scmp.lt.u32.totalorder %s562_s26, %s821_s2 }
  0x29   :  { %p568_p4 = pnand %p566_p3, %p563_p2 }
  0x2b   :  { %571 = shalt.err (!%p568_p4)
}
  0x2c   :  { %s572_s9 = scalar_lea.vmem %s45_s14, 1024  ;;  %p577_p6 = scmp.lt.s32.totalorder %s45_s14, %s45_s14 }
  0x2d   :  { %p573_p5 = scmp.ne.s32.totalorder %s45_s14, %s572_s9  ;;  %p578_p7 = scmp.lt.s32.totalorder %s572_s9, %s572_s9 }
  0x2f   :  { %p579_p8 = por %p578_p7, %p577_p6 }
  0x31   :  { %p580_p9 = pnand %p579_p8, %p573_p5 }
  0x33   :  { %583 = shalt.err (!%p580_p9)
}
  0x34   :  { %50 = dma.hbm_to_vmem [thread:$0]  %s821_s2, 1024, %s45_s14, [#allocation6], %s661_s7, %s661_s7, %s662_s8  }
  0x35   :  { %s665_s11 = smov [#allocation8]   ;;  %s584_s16 = scalar_lea.hbm %s822_s3, 1024 }
  0x36   :  { %s56_s12 = sshll.u32 %s665_s11, 4  ;;  %p585_p10 = scmp.ne.s32.totalorder %s822_s3, %s584_s16  ;;  %s57_s12 = int_to_ptr.vmem [resolvable:$true] %s56_s12 }
  0x37   :  { %p588_p11 = scmp.lt.u32.totalorder %s584_s16, %s822_s3 }
  0x39   :  { %p590_p12 = pnand %p588_p11, %p585_p10 }
  0x3b   :  { %593 = shalt.err (!%p590_p12)
}
  0x3c   :  { %s594_s21 = scalar_lea.vmem %s57_s12, 1024  ;;  %p599_p0 = scmp.lt.s32.totalorder %s57_s12, %s57_s12 }
  0x3d   :  { %p595_p13 = scmp.ne.s32.totalorder %s57_s12, %s594_s21  ;;  %p600_p1 = scmp.lt.s32.totalorder %s594_s21, %s594_s21 }
  0x3f   :  { %p601_p2 = por %p600_p1, %p599_p0 }
  0x41   :  { %p602_p3 = pnand %p601_p2, %p595_p13 }
  0x43   :  { %605 = shalt.err (!%p602_p3)
}
  0x44   :  { %62 = dma.hbm_to_vmem [thread:$0]  %s822_s3, 1024, %s57_s12, [#allocation9], %s661_s7, %s661_s7, %s662_s8  }
  0x45   :  { %650 = dma.done.wait [#allocation3], 64  }
  0x46   :  { %651 = vsyncadd [#allocation3], 4294967232 }
  0x47   :  { %652 = dma.done.wait [#allocation6], 1280  }
  0x48   :  { %653 = vsyncadd [#allocation6], 4294966016 }
  0x49   :  { %654 = dma.done.wait [#allocation9], 1024  }
  0x4a   :  { %655 = vsyncadd [#allocation9], 4294966272  ;;  %v666_v0 = vmov 0.0   ;;  %vm667_vm0 = vmmov 0   ;;  %v500_v1 = vld [vmem:[#allocation5] sm:$0xff]   ;;  %v501_v2 = vld [vmem:[#allocation5 + $0x8] sm:$0xff]  }
  0x4b   :  { %442 = vmatprep.subr.bf16.mxu0 %v666_v0  ;;  %446 = vmatprep.mubr.msk.bf16.mxu0 %vm667_vm0, %v666_v0  ;;  %v502_v3 = vld [vmem:[#allocation7] sm:$0xff]   ;;  %vm102_vm1 = vcmask 261120   ;;  %v503_v4 = vld [vmem:[#allocation7 + $0x8] sm:$0xff]   ;;  %v504_v6 = vld [vmem:[#allocation7 + $0x10] sm:$0xff]   ;;  %s668_s22 = smov [#allocation11]  }
  0x4c   :  { %450 = vmatprep.subr.bf16.mxu1 %v666_v0  ;;  %466 = vmatprep.mubr.msk.bf16.mxu1 %vm667_vm0, %v666_v0  ;;  %v78_v5 = vld [vmem:[#allocation2] sm:$0xf]  ;;  %v505_v7 = vld [vmem:[#allocation7 + $0x18] sm:$0xff]   ;;  %v506_v8 = vld [vmem:[#allocation7 + $0x20] sm:$0xff]   ;;  %s384_s23 = sshll.u32 %s668_s22, 4  ;;  %s385_s23 = int_to_ptr.vmem [resolvable:$true] %s384_s23 }
  0x4d   :  { %443 = vmatpush3.bf16.msra.mxu0 %v500_v1  ;;  %451 = vmatpush3.bf16.msra.mxu1 %v502_v3  ;;  %v507_v9 = vld [vmem:[#allocation7 + $0x28] sm:$0xff]   ;;  %v508_v10 = vld [vmem:[#allocation7 + $0x30] sm:$0xff]   ;;  %v509_v11 = vld [vmem:[#allocation7 + $0x38] sm:$0xff]   ;;  %s606_s24 = scalar_lea.vmem %s385_s23, 128  ;;  %p611_p5 = scmp.lt.s32.totalorder %s385_s23, %s385_s23 }
  0x4e   :  { %444 = vmatprep.subr.bf16.mxu0 %v666_v0  ;;  %452 = vmatprep.subr.bf16.mxu1 %v666_v0  ;;  %v510_v12 = vld [vmem:[#allocation8] sm:$0xff]   ;;  %v511_v13 = vld [vmem:[#allocation8 + $0x8] sm:$0xff]   ;;  %v512_v14 = vld [vmem:[#allocation8 + $0x10] sm:$0xff]   ;;  %p607_p4 = scmp.ne.s32.totalorder %s385_s23, %s606_s24  ;;  %p612_p6 = scmp.lt.s32.totalorder %s606_s24, %s606_s24 }
  0x4f   :  { %v513_v15 = vld [vmem:[#allocation8 + $0x18] sm:$0xff]   ;;  %v514_v16 = vld [vmem:[#allocation8 + $0x20] sm:$0xff]   ;;  %v515_v17 = vld [vmem:[#allocation8 + $0x28] sm:$0xff]  }
  0x50   :  { %v399_v18 = vld [vmem:[%s823_s4] ss:$0 sm:$0xff]  ;;  %v516_v26 = vld [vmem:[#allocation8 + $0x30] sm:$0xff]   ;;  %v517_v27 = vld [vmem:[#allocation8 + $0x38] sm:$0xff]   ;;  %p613_p7 = por %p612_p6, %p611_p5 }
  0x51   :  { %445 = vmatpush3.bf16.msra.mxu0 %v501_v2  ;;  %453 = vmatpush3.bf16.msra.mxu1 %v503_v4  ;;  %v403_v28 = vld [vmem:[%s823_s4 + $0x1] ss:$0 sm:$0xff] }
  0x52   :  { %470 = vmatprep.subr.bf16.mxu0 %v666_v0  ;;  %454 = vmatprep.subr.bf16.mxu1 %v666_v0  ;;  %p614_p8 = pnand %p613_p7, %p607_p4 }
  0x54   :  { %447 = vmatmul.mubr.msk.bf16.vlgmr.msra.gmra.mrb[0].mxu0 %vm102_vm1, %v78_v5 }
  0x55   :  { %486 = vmatprep.mubr.msk.bf16.mxu0 %vm667_vm0, %v666_v0  ;;  %455 = vmatpush3.bf16.msra.mxu1 %v504_v6 }
  0x56   :  { %456 = vmatprep.subr.bf16.mxu1 %v666_v0  ;;  %471 = vmatpush3.bf16.msra.mxu0 %v510_v12 }
  0x57   :  { %472 = vmatprep.subr.bf16.mxu0 %v666_v0 }
  0x59   :  { %457 = vmatpush3.bf16.msra.mxu1 %v505_v7 }
  0x5a   :  { %458 = vmatprep.subr.bf16.mxu1 %v666_v0  ;;  %473 = vmatpush3.bf16.msra.mxu0 %v511_v13 }
  0x5b   :  { %474 = vmatprep.subr.bf16.mxu0 %v666_v0 }
  0x5d   :  { %459 = vmatpush3.bf16.msra.mxu1 %v506_v8 }
  0x5e   :  { %460 = vmatprep.subr.bf16.mxu1 %v666_v0  ;;  %475 = vmatpush3.bf16.msra.mxu0 %v512_v14 }
  0x5f   :  { %476 = vmatprep.subr.bf16.mxu0 %v666_v0 }
  0x61   :  { %461 = vmatpush3.bf16.msra.mxu1 %v507_v9 }
  0x62   :  { %462 = vmatprep.subr.bf16.mxu1 %v666_v0  ;;  %477 = vmatpush3.bf16.msra.mxu0 %v513_v15 }
  0x63   :  { %478 = vmatprep.subr.bf16.mxu0 %v666_v0 }
  0x65   :  { %463 = vmatpush3.bf16.msra.mxu1 %v508_v10 }
  0x66   :  { %464 = vmatprep.subr.bf16.mxu1 %v666_v0  ;;  %479 = vmatpush3.bf16.msra.mxu0 %v514_v16 }
  0x67   :  { %480 = vmatprep.subr.bf16.mxu0 %v666_v0 }
  0x69   :  { %465 = vmatpush3.bf16.msra.mxu1 %v509_v11 }
  0x6a   :  { %481 = vmatpush3.bf16.msra.mxu0 %v515_v17 }
  0x6b   :  { %482 = vmatprep.subr.bf16.mxu0 %v666_v0 }
  0x6e   :  { %483 = vmatpush3.bf16.msra.mxu0 %v516_v26 }
  0x6f   :  { %484 = vmatprep.subr.bf16.mxu0 %v666_v0 }
  0x72   :  { %485 = vmatpush3.bf16.msra.mxu0 %v517_v27 }
 0x127   :  { %v140_v19 = vpop.f32.mrb[0].mxu0 }
 0x128   :  { %v141_v20 = vadd.f32 %v399_v18, %v140_v19  ;;  %v448_v21 = vpop.f32.mrb[1].mxu0 }
 0x129   :  { %v143_v22 = vpop.f32.mrb[2].mxu0 }
 0x12a   :  { %v146_v23 = vmax.f32 %v141_v20, 0.0  ;;  %v449_v24 = vpop.f32.mrb[3].mxu0 }
 0x12c   :  { %v147_v25 = vpack.c.bf16 %v146_v23, %v146_v23 }
 0x12e   :  { %467 = vmatmul.mubr.bf16.vlgmr.msra.gmra.mrb[0].mxu1 %v147_v25 }
 0x201   :  { %v250_v29 = vpop.f32.mrb[0].mxu1 }
 0x202   :  { %v251_v30 = vadd.f32 %v403_v28, %v250_v29  ;;  %v468_v31 = vpop.f32.mrb[1].mxu1 }
 0x203   :  { %v253_v32 = vpop.f32.mrb[2].mxu1 }
 0x204   :  { %v256_v33 = vmax.f32 %v251_v30, 0.0  ;;  %v469_v34 = vpop.f32.mrb[3].mxu1 }
 0x206   :  { %v257_v35 = vpack.c.bf16 %v256_v33, %v256_v33  ;;  %366 = vst [vmem:[#allocation11] sm:$0xff] %v256_v33 }
 0x208   :  { %487 = vmatmul.mubr.bf16.vlgmr.msra.gmra.mrb[4].mxu0 %v257_v35 }
 0x209   :  { %617 = shalt.err (!%p614_p8)
}
 0x20a   :  { %s618_s27 = scalar_lea.hbm %s825_s6, 128 }
 0x20b   :  { %p619_p9 = scmp.ne.s32.totalorder %s825_s6, %s618_s27  ;;  %p622_p10 = scmp.lt.u32.totalorder %s618_s27, %s825_s6 }
 0x20d   :  { %p624_p11 = pnand %p622_p10, %p619_p9 }
 0x20f   :  { %627 = shalt.err (!%p624_p11)
}
 0x210   :  { %387 = dma.vmem_to_hbm [thread:$0]  %s385_s23, 128, %s825_s6, [#allocation12]   ;;  %v412_v36 = vld [vmem:[%s823_s4 + $0x2] ss:$0 sm:$0xff] }
 0x211   :  { %s669_s13 = smov [#allocation10]  }
 0x212   :  { %s374_s15 = sshll.u32 %s669_s13, 4  ;;  %s375_s15 = int_to_ptr.vmem [resolvable:$true] %s374_s15 }
 0x213   :  { %s628_s16 = scalar_lea.vmem %s375_s15, 128  ;;  %p633_p13 = scmp.lt.s32.totalorder %s375_s15, %s375_s15 }
 0x214   :  { %p629_p12 = scmp.ne.s32.totalorder %s375_s15, %s628_s16  ;;  %p634_p0 = scmp.lt.s32.totalorder %s628_s16, %s628_s16 }
 0x216   :  { %p635_p1 = por %p634_p0, %p633_p13 }
 0x218   :  { %p636_p2 = pnand %p635_p1, %p629_p12 }
 0x2db   :  { %v360_v37 = vpop.f32.mrb[4].mxu0 }
 0x2dc   :  { %v361_v38 = vadd.f32 %v412_v36, %v360_v37  ;;  %v488_v39 = vpop.f32.mrb[5].mxu0 }
 0x2dd   :  { %v363_v40 = vpop.f32.mrb[6].mxu0 }
 0x2de   :  { %367 = vst [vmem:[#allocation10] sm:$0xff] %v361_v38  ;;  %v489_v41 = vpop.f32.mrb[7].mxu0 }
 0x2df   :  { %639 = shalt.err (!%p636_p2)
}
 0x2e0   :  { %s640_s4 = scalar_lea.hbm %s824_s5, 128 }
 0x2e1   :  { %p641_p3 = scmp.ne.s32.totalorder %s824_s5, %s640_s4  ;;  %p644_p4 = scmp.lt.u32.totalorder %s640_s4, %s824_s5 }
 0x2e3   :  { %p646_p5 = pnand %p644_p4, %p641_p3 }
 0x2e5   :  { %649 = shalt.err (!%p646_p5)
}
 0x2e6   :  { %377 = dma.vmem_to_hbm [thread:$0]  %s375_s15, 128, %s824_s5, [#allocation4]  }
 0x2e7   :  { %656 = dma.done.wait [#allocation4], 128  }
 0x2e8   :  { %657 = vsyncadd [#allocation4], 4294967168 }
 0x2e9   :  { %658 = dma.done.wait [#allocation12], 128  }
 0x2ea   :  { %659 = vsyncadd [#allocation12], 4294967168 }
 0x2eb   :  { %394 = vsyncpa [#allocation3], 1 }
 0x2ec   :  { %395 = vsyncpa [#allocation6], 1 }
 0x2ed   :  { %396 = vsyncpa [#allocation9], 1 }
 0x2ee   :  { %397 = vsyncpa [#allocation4], 1 }
 0x2ef   :  { %398 = vsyncpa [#allocation12], 1 }

</bundles_post_ra>
